<compile_context>
chip_gen: v6e
topology: v6e:2x2x1
jax: 0.10.0
libtpu: 0.0.40
codegen_flags: <defaults>
</compile_context>

<pallas_src>
import jax
import jax.numpy as jnp
from jax.experimental import pallas as pl
from jax.experimental.pallas import tpu as pltpu

# ---------------------------------------------------------------------------
# Model / problem sizes (small, deterministic)
# ---------------------------------------------------------------------------
B = 2            # batch
N = 64           # num_vertices
C_IN = 4         # in_channels
H1 = 64          # hidden 1
H2 = 128         # hidden 2
CODE = 32        # code_size

LANES = 128      # lane width used for operand packing
W3_ROW0 = 8      # sublane-aligned start row of w3 inside the w13 slab

_BN_EPS = 1e-5


# ---------------------------------------------------------------------------
# Pallas kernel: single (gridless) invocation — 3 matmuls (BN pre-folded) +
# ReLU + per-batch max-pool over vertices.
# ---------------------------------------------------------------------------
def _encoder_kernel(
    x_ref,       # (B*N, C_IN)           f32
    w2_ref,      # (H1, H2)              f32, BN folded
    w13_ref,     # (W3_ROW0 + H2, 128)   f32, rows [0:C_IN, :H1]=w1, [8:8+H2, :CODE]=w3
    bias_ref,    # (3, 128)              f32, rows = b1 | b2 | b3 (lane padded)
    o_ref,       # (B, CODE)             f32
):
    x = x_ref[...]                                      # (B*N, C_IN)

    # Static slices of the packed slabs (tiny, all in VMEM already).
    w1 = w13_ref[0:C_IN, 0:H1]                          # (C_IN, H1)
    w3 = w13_ref[W3_ROW0:W3_ROW0 + H2, 0:CODE]          # (H2, CODE)
    b1 = bias_ref[0:1, 0:H1]                            # (1, H1)
    b2 = bias_ref[1:2, 0:H2]                            # (1, H2)
    b3 = bias_ref[2:3, 0:CODE]                          # (1, CODE)

    # Block 1: conv1x1 (+BN folded) -> ReLU
    h = jnp.dot(x, w1, preferred_element_type=jnp.float32) + b1
    h = jnp.maximum(h, 0.0)

    # Block 2: conv1x1 (+BN folded) -> ReLU
    h = jnp.dot(h, w2_ref[...], preferred_element_type=jnp.float32) + b2
    h = jnp.maximum(h, 0.0)

    # Block 3: conv1x1 (+BN folded), no ReLU
    h = jnp.dot(h, w3, preferred_element_type=jnp.float32) + b3      # (B*N, CODE)

    # Max-pool over the vertex axis, per batch (static slices, B is tiny).
    pooled = [
        jnp.max(h[b * N:(b + 1) * N, :], axis=0, keepdims=True)       # (1, CODE)
        for b in range(B)
    ]
    # One tiny (B, CODE) store; lane-dense padding only worth it if this were
    # written per grid iteration.
    o_ref[...] = jnp.concatenate(pooled, axis=0)


_VMEM_SPEC = pl.BlockSpec(memory_space=pltpu.MemorySpace.VMEM)


def _fuse_bn(w, b, gamma, beta, mean, var):
    """Fold eval-mode BatchNorm1d (with real running stats) into the conv."""
    scale = gamma / jnp.sqrt(var + _BN_EPS)             # (1, C_out)
    return w * scale, (b - mean) * scale + beta


@jax.jit
def base_encoder(x, params):
    """x: [B, N, C_IN] float32 -> latent code [B, CODE] float32."""
    (w1, b1, g1, be1, rm1, rv1,
     w2, b2, g2, be2, rm2, rv2,
     w3, b3, g3, be3, rm3, rv3) = params

    # Structural BN fold (once, in the wrapper — not per kernel step).
    w1f, b1f = _fuse_bn(w1, b1, g1, be1, rm1, rv1)
    w2f, b2f = _fuse_bn(w2, b2, g2, be2, rm2, rv2)
    w3f, b3f = _fuse_bn(w3, b3, g3, be3, rm3, rv3)

    # Pack tiny operands to cut DMA-descriptor count.
    bias_slab = jnp.zeros((3, LANES), jnp.float32)
    bias_slab = bias_slab.at[0, :H1].set(b1f[0])
    bias_slab = bias_slab.at[1, :H2].set(b2f[0])
    bias_slab = bias_slab.at[2, :CODE].set(b3f[0])

    w13_slab = jnp.zeros((W3_ROW0 + H2, LANES), jnp.float32)
    w13_slab = w13_slab.at[:C_IN, :H1].set(w1f)
    w13_slab = w13_slab.at[W3_ROW0:W3_ROW0 + H2, :CODE].set(w3f)

    xf = x.reshape(B * N, C_IN)   # big-M activation for the MXU

    out = pl.pallas_call(
        _encoder_kernel,
        out_shape=jax.ShapeDtypeStruct((B, CODE), jnp.float32),
        in_specs=[_VMEM_SPEC, _VMEM_SPEC, _VMEM_SPEC, _VMEM_SPEC],
        out_specs=_VMEM_SPEC,
    )(xf, w2f, w13_slab, bias_slab)

    return out


# ---------------------------------------------------------------------------
# Deterministic parameter init mirroring BaseShapeModule._default_gaussian_*
# (plus explicit BN running stats, made non-trivial so the fold is tested).
# ---------------------------------------------------------------------------
def init_params(key):
    keys = jax.random.split(key, 15)
    conv_sigma = 0.02
    bn_gamma_sigma = 0.02

    def conv_w(k, cin, cout):
        # nn.init.normal_(conv.weight, mean=0, std=0.02)
        return conv_sigma * jax.random.normal(k, (cin, cout), jnp.float32)

    def conv_b(k, cout):
        # PyTorch default Conv1d bias is U(-1/sqrt(fan_in), ...); deterministic
        # small Gaussian here (affects reproducibility vs torch, not the math).
        return 0.01 * jax.random.normal(k, (1, cout), jnp.float32)

    def bn_gamma(k, cout):
        # nn.init.normal_(bn.weight, mean=1.0, std=0.02)
        return 1.0 + bn_gamma_sigma * jax.random.normal(k, (1, cout), jnp.float32)

    def bn_beta(cout):
        # nn.init.constant_(bn.bias, 0.0)
        return jnp.zeros((1, cout), jnp.float32)

    def bn_stats(km, kv, cout):
        # Non-trivial "running" stats so the BN fold is actually exercised.
        rm = 0.1 * jax.random.normal(km, (1, cout), jnp.float32)
        rv = 1.0 + 0.1 * jnp.abs(jax.random.normal(kv, (1, cout), jnp.float32))
        return rm, rv

    w1 = conv_w(keys[0], C_IN, H1); b1 = conv_b(keys[1], H1)
    g1 = bn_gamma(keys[2], H1); be1 = bn_beta(H1)
    rm1, rv1 = bn_stats(keys[3], keys[4], H1)

    w2 = conv_w(keys[5], H1, H2); b2 = conv_b(keys[6], H2)
    g2 = bn_gamma(keys[7], H2); be2 = bn_beta(H2)
    rm2, rv2 = bn_stats(keys[8], keys[9], H2)

    w3 = conv_w(keys[10], H2, CODE); b3 = conv_b(keys[11], CODE)
    g3 = bn_gamma(keys[12], CODE); be3 = bn_beta(CODE)
    rm3, rv3 = bn_stats(keys[13], keys[14], CODE)

    return (w1, b1, g1, be1, rm1, rv1,
            w2, b2, g2, be2, rm2, rv2,
            w3, b3, g3, be3, rm3, rv3)


def reference_encoder(x, params):
    # Un-fused reference (conv + explicit eval-mode BN with running stats),
    # validating both the kernel math and the BN fold.
    (w1, b1, g1, be1, rm1, rv1,
     w2, b2, g2, be2, rm2, rv2,
     w3, b3, g3, be3, rm3, rv3) = params

    def bn(v, g, be, rm, rv):
        return (v - rm) * (g / jnp.sqrt(rv + _BN_EPS)) + be

    h = jnp.maximum(bn(x @ w1 + b1, g1, be1, rm1, rv1), 0.0)
    h = jnp.maximum(bn(h @ w2 + b2, g2, be2, rm2, rv2), 0.0)
    h = bn(h @ w3 + b3, g3, be3, rm3, rv3)
    return jnp.max(h, axis=1)  # max over vertices -> [B, CODE]


if __name__ == "__main__":
    key = jax.random.PRNGKey(0)
    kx, kp = jax.random.split(key)

    x = jax.random.normal(kx, (B, N, C_IN), jnp.float32)
    params = init_params(kp)

    out = base_encoder(x, params)
    out = jax.block_until_ready(out)

    ref = reference_encoder(x, params)
    assert out.shape == (B, CODE)
    assert jnp.allclose(out, ref, rtol=1e-4, atol=1e-5), "mismatch vs reference"

    print("KERNEL_OK")
</pallas_src>

<mosaic_0001>
module attributes {stable_mosaic.version = 11 : i64} {
  func.func @_encoder_kernel(%arg0: memref<128x4xf32, #tpu.memory_space<vmem>>, %arg1: memref<64x128xf32, #tpu.memory_space<vmem>>, %arg2: memref<136x128xf32, #tpu.memory_space<vmem>>, %arg3: memref<3x128xf32, #tpu.memory_space<vmem>>, %arg4: memref<2x32xf32, #tpu.memory_space<vmem>>) attributes {dimension_semantics = [], scalar_prefetch = 0 : i64, scratch_operands = 0 : i64, tpu.core_type = #tpu.core_type<tc>} {
    %c0 = arith.constant 0 : index
    %c0_0 = arith.constant 0 : index
    %0 = vector.load %arg0[%c0, %c0_0] : memref<128x4xf32, #tpu.memory_space<vmem>>, vector<128x4xf32>
    %c0_1 = arith.constant 0 : index
    %c0_2 = arith.constant 0 : index
    %1 = vector.load %arg2[%c0_1, %c0_2] : memref<136x128xf32, #tpu.memory_space<vmem>>, vector<4x64xf32>
    %c8 = arith.constant 8 : index
    %c0_3 = arith.constant 0 : index
    %2 = vector.load %arg2[%c8, %c0_3] : memref<136x128xf32, #tpu.memory_space<vmem>>, vector<128x32xf32>
    %c0_4 = arith.constant 0 : index
    %c0_5 = arith.constant 0 : index
    %3 = vector.load %arg3[%c0_4, %c0_5] : memref<3x128xf32, #tpu.memory_space<vmem>>, vector<1x64xf32>
    %c1 = arith.constant 1 : index
    %c0_6 = arith.constant 0 : index
    %4 = vector.load %arg3[%c1, %c0_6] : memref<3x128xf32, #tpu.memory_space<vmem>>, vector<1x128xf32>
    %c2 = arith.constant 2 : index
    %c0_7 = arith.constant 0 : index
    %5 = vector.load %arg3[%c2, %c0_7] : memref<3x128xf32, #tpu.memory_space<vmem>>, vector<1x32xf32>
    %cst = arith.constant dense<0.000000e+00> : vector<128x64xf32>
    %6 = tpu.matmul %0, %1, %cst {dimension_numbers = #tpu.dot_dimension_numbers<[1], [0], [0], [1], [0, 0, 1, 1], [], []>} : vector<128x4xf32>, vector<4x64xf32>, vector<128x64xf32> -> vector<128x64xf32>
    %7 = vector.broadcast %3 : vector<1x64xf32> to vector<128x64xf32>
    %8 = arith.addf %6, %7 : vector<128x64xf32>
    %cst_8 = arith.constant 0.000000e+00 : f32
    %9 = vector.broadcast %cst_8 : f32 to vector<128x64xf32>
    %10 = arith.maximumf %8, %9 : vector<128x64xf32>
    %c0_9 = arith.constant 0 : index
    %c0_10 = arith.constant 0 : index
    %11 = vector.load %arg1[%c0_9, %c0_10] : memref<64x128xf32, #tpu.memory_space<vmem>>, vector<64x128xf32>
    %cst_11 = arith.constant dense<0.000000e+00> : vector<128x128xf32>
    %12 = tpu.matmul %10, %11, %cst_11 {dimension_numbers = #tpu.dot_dimension_numbers<[1], [0], [0], [1], [0, 0, 1, 1], [], []>} : vector<128x64xf32>, vector<64x128xf32>, vector<128x128xf32> -> vector<128x128xf32>
    %13 = vector.broadcast %4 : vector<1x128xf32> to vector<128x128xf32>
    %14 = arith.addf %12, %13 : vector<128x128xf32>
    %cst_12 = arith.constant 0.000000e+00 : f32
    %15 = vector.broadcast %cst_12 : f32 to vector<128x128xf32>
    %16 = arith.maximumf %14, %15 : vector<128x128xf32>
    %cst_13 = arith.constant dense<0.000000e+00> : vector<128x32xf32>
    %17 = tpu.matmul %16, %2, %cst_13 {dimension_numbers = #tpu.dot_dimension_numbers<[1], [0], [0], [1], [0, 0, 1, 1], [], []>} : vector<128x128xf32>, vector<128x32xf32>, vector<128x32xf32> -> vector<128x32xf32>
    %18 = vector.broadcast %5 : vector<1x32xf32> to vector<128x32xf32>
    %19 = arith.addf %17, %18 : vector<128x32xf32>
    %20 = vector.extract_strided_slice %19 {offsets = [0, 0], sizes = [64, 32], strides = [1, 1]} : vector<128x32xf32> to vector<64x32xf32>
    %cst_14 = arith.constant dense<0xFF800000> : vector<32xf32>
    %21 = vector.multi_reduction <maximumf>, %20, %cst_14 [0] : vector<64x32xf32> to vector<32xf32>
    %22 = vector.shape_cast %21 : vector<32xf32> to vector<1x32xf32>
    %23 = vector.extract_strided_slice %19 {offsets = [64, 0], sizes = [64, 32], strides = [1, 1]} : vector<128x32xf32> to vector<64x32xf32>
    %cst_15 = arith.constant dense<0xFF800000> : vector<32xf32>
    %24 = vector.multi_reduction <maximumf>, %23, %cst_15 [0] : vector<64x32xf32> to vector<32xf32>
    %25 = vector.shape_cast %24 : vector<32xf32> to vector<1x32xf32>
    %26 = tpu.concatenate %22, %25 in 0 : vector<1x32xf32>, vector<1x32xf32> -> vector<2x32xf32>
    %c0_16 = arith.constant 0 : index
    %c0_17 = arith.constant 0 : index
    %27 = vector.load %arg4[%c0_16, %c0_17] : memref<2x32xf32, #tpu.memory_space<vmem>>, vector<2x32xf32>
    tpu.vector_store %arg4[%c0_16, %c0_17], %26 {strides = array<i32>} : memref<2x32xf32, #tpu.memory_space<vmem>>, vector<2x32xf32>,
    return
  }
}

</mosaic_0001>

<bundles_post_ra>
// kernel: base_encoder.1
= control target key start
LH: loop header
LB: loop body
LE: loop exit
PB: predicated region body
PF: predicated region fallthrough
CT: control target
= control target key end

     0   :  { %vm107_vm0 = vcmask 1043456   ;;  %vm58_vm1 = vcmask 31744   ;;  %s1271_s0 = inlined_call_operand.vmem [shape: f32[128,4], index: 0, kind: input, shape index: {}]   ;;  %s1272_s1 = inlined_call_operand.vmem [shape: f32[64,128], index: 1, kind: input, shape index: {}]   ;;  %s1273_s2 = inlined_call_operand.vmem [shape: f32[136,128], index: 2, kind: input, shape index: {}]   ;;  %s1274_s3 = inlined_call_operand.vmem [shape: f32[3,128], index: 3, kind: input, shape index: {}]   ;;  %s1275_s4 = inlined_call_operand.hbm [shape: f32[2,32], index: 4, kind: output, shape index: {}]  }
   0x1   :  { %v34_v0 = vld [vmem:[%s1273_s2] sm:$0xf]  ;;  %v19_v2 = vld [vmem:[%s1271_s0 + $0x8] sm:$0xff]  ;;  %v20_v3 = vld [vmem:[%s1271_s0 + $0x10] sm:$0xff] }
   0x2   :  { %v18_v1 = vld [vmem:[%s1271_s0] sm:$0xff]  ;;  %813 = vmatprep.subr.msk.mxu0 %vm107_vm0, %v34_v0  ;;  %v21_v4 = vld [vmem:[%s1271_s0 + $0x18] sm:$0xff]  ;;  %v278_v7 = vld [vmem:[%s1272_s1 + $0x30] sm:$0xff] }
   0x3   :  { %815 = vmatprep.mubr.msk.f32.mxu0 %vm58_vm1, %v18_v1  ;;  %814 = vmatpush3.msk.msra.mxu0 %vm107_vm0, %v34_v0  ;;  %v22_v5 = vld [vmem:[%s1271_s0 + $0x20] sm:$0xff]  ;;  %v279_v6 = vld [vmem:[%s1272_s1 + $0x38] sm:$0xff]  ;;  %v277_v8 = vld [vmem:[%s1272_s1 + $0x28] sm:$0xff] }
   0x4   :  { %816 = vmatmul.mubr.msk.f32.vlgmr.msra.gmra.mxu0 %vm58_vm1, %v19_v2  ;;  %839 = vmatprep.subr.mxu1 %v279_v6 }
   0x5   :  { %818 = vmatprep.mubr.msk.f32.mxu0 %vm58_vm1, %v20_v3  ;;  %840 = vmatpush3.msra.mxu1 %v279_v6 }
   0x8   :  { %819 = vmatmul.mubr.msk.f32.gmra.mxu0 %vm58_vm1, %v21_v4 }
   0x9   :  { %9 = vsyncpa [#allocation3], 0  ;;  %821 = vmatprep.mubr.msk.f32.mxu0 %vm58_vm1, %v22_v5  ;;  %v23_v9 = vld [vmem:[%s1271_s0 + $0x28] sm:$0xff]  ;;  %841 = vmatprep.subr.mxu1 %v278_v7  ;;  %v24_v10 = vld [vmem:[%s1271_s0 + $0x30] sm:$0xff]  ;;  %vm284_vm2 = vcmask 523264   ;;  %vm643_vm3 = vcmask 261120  }
   0xa   :  { %842 = vmatpush3.msra.mxu1 %v278_v7  ;;  %v276_v11 = vld [vmem:[%s1272_s1 + $0x20] sm:$0xff]  ;;  %v25_v12 = vld [vmem:[%s1271_s0 + $0x38] sm:$0xff]  ;;  %v27_v14 = vld [vmem:[%s1271_s0 + $0x48] sm:$0xff]  ;;  %vm686_vm4 = vcmask 1040384   ;;  %vm688_vm5 = vcmask 254976  }
   0xb   :  { %843 = vmatprep.subr.mxu1 %v277_v8  ;;  %v26_v13 = vld [vmem:[%s1271_s0 + $0x40] sm:$0xff]  ;;  %v28_v15 = vld [vmem:[%s1271_s0 + $0x50] sm:$0xff]  ;;  %v29_v16 = vld [vmem:[%s1271_s0 + $0x58] sm:$0xff] }
   0xc   :  { %822 = vmatmul.mubr.msk.f32.gmra.mxu0 %vm58_vm1, %v23_v9  ;;  %844 = vmatpush3.msra.mxu1 %v277_v8  ;;  %v30_v17 = vld [vmem:[%s1271_s0 + $0x60] sm:$0xff]  ;;  %v31_v18 = vld [vmem:[%s1271_s0 + $0x68] sm:$0xff]  ;;  %v32_v19 = vld [vmem:[%s1271_s0 + $0x70] sm:$0xff] }
   0xd   :  { %824 = vmatprep.mubr.msk.f32.mxu0 %vm58_vm1, %v24_v10  ;;  %845 = vmatprep.subr.mxu1 %v276_v11  ;;  %v33_v20 = vld [vmem:[%s1271_s0 + $0x78] sm:$0xff]  ;;  %v274_v22 = vld [vmem:[%s1272_s1 + $0x10] sm:$0xff]  ;;  %v273_v23 = vld [vmem:[%s1272_s1 + $0x8] sm:$0xff] }
   0xe   :  { %846 = vmatpush3.msra.mxu1 %v276_v11  ;;  %v275_v21 = vld [vmem:[%s1272_s1 + $0x18] sm:$0xff]  ;;  %v272_v24 = vld [vmem:[%s1272_s1] sm:$0xff]  ;;  %v48_v27 = vld [vmem:[%s1273_s2 + $0x70] sm:$0xff] }
   0xf   :  { %847 = vmatprep.subr.mxu1 %v275_v21  ;;  %v50_v25 = vld [vmem:[%s1273_s2 + $0x80] sm:$0xff]  ;;  %v49_v26 = vld [vmem:[%s1273_s2 + $0x78] sm:$0xff]  ;;  %v1119_v28 = vld [vmem:[%s1273_s2 + $0x68] sm:$0xff] }
  0x10   :  { %825 = vmatmul.mubr.msk.f32.gmra.mxu0 %vm58_vm1, %v25_v12  ;;  %848 = vmatpush3.msra.mxu1 %v275_v21  ;;  %v1124_v29 = vld [vmem:[%s1273_s2 + $0x60] sm:$0xff]  ;;  %v1131_v30 = vld [vmem:[%s1273_s2 + $0x58] sm:$0xff]  ;;  %v1138_v31 = vld [vmem:[%s1273_s2 + $0x50] sm:$0xff] }
  0x11   :  { %827 = vmatprep.mubr.msk.f32.mxu0 %vm58_vm1, %v26_v13  ;;  %849 = vmatprep.subr.mxu1 %v274_v22  ;;  %v1145_v32 = vld [vmem:[%s1273_s2 + $0x48] sm:$0xff]  ;;  %v1152_v33 = vld [vmem:[%s1273_s2 + $0x40] sm:$0xff]  ;;  %v1159_v34 = vld [vmem:[%s1273_s2 + $0x38] sm:$0xff] }
  0x12   :  { %850 = vmatpush3.msra.mxu1 %v274_v22  ;;  %879 = vmatprep.subr.mxu0 %v50_v25  ;;  %v1166_v35 = vld [vmem:[%s1273_s2 + $0x30] sm:$0xff]  ;;  %v1173_v36 = vld [vmem:[%s1273_s2 + $0x28] sm:$0xff]  ;;  %v1182_v37 = vld [vmem:[%s1274_s3] ss:$0 sm:$0xff] }
  0x13   :  { %851 = vmatprep.subr.mxu1 %v273_v23  ;;  %880 = vmatpush3.msra.mxu0 %v50_v25  ;;  %v38_v22 = vld [vmem:[%s1273_s2 + $0x20] sm:$0xff] }
  0x14   :  { %828 = vmatmul.mubr.msk.f32.gmra.mxu0 %vm58_vm1, %v27_v14  ;;  %852 = vmatpush3.msra.mxu1 %v273_v23  ;;  %v37_v23 = vld [vmem:[%s1273_s2 + $0x18] sm:$0xff] }
  0x15   :  { %830 = vmatprep.mubr.msk.f32.mxu0 %vm58_vm1, %v28_v15  ;;  %853 = vmatprep.subr.mxu1 %v272_v24 }
  0x16   :  { %854 = vmatpush3.msra.mxu1 %v272_v24  ;;  %881 = vmatprep.subr.mxu0 %v49_v26  ;;  %v36_v24 = vld [vmem:[%s1273_s2 + $0x10] sm:$0xff] }
  0x17   :  { %935 = vmatprep.subr.mxu1 %v50_v25  ;;  %882 = vmatpush3.msra.mxu0 %v49_v26 }
  0x18   :  { %831 = vmatmul.mubr.msk.f32.gmra.mxu0 %vm58_vm1, %v29_v16  ;;  %883 = vmatprep.subr.mxu0 %v48_v27 }
  0x19   :  { %833 = vmatprep.mubr.msk.f32.mxu0 %vm58_vm1, %v30_v17  ;;  %884 = vmatpush3.msra.mxu0 %v48_v27 }
  0x1a   :  { %885 = vmatprep.subr.mxu0 %v1119_v28 }
  0x1b   :  { %886 = vmatpush3.msra.mxu0 %v1119_v28 }
  0x1c   :  { %834 = vmatmul.mubr.msk.f32.gmra.mxu0 %vm58_vm1, %v31_v18  ;;  %887 = vmatprep.subr.mxu0 %v1124_v29 }
  0x1d   :  { %836 = vmatprep.mubr.msk.f32.mxu0 %vm58_vm1, %v32_v19  ;;  %888 = vmatpush3.msra.mxu0 %v1124_v29 }
  0x1e   :  { %889 = vmatprep.subr.mxu0 %v1131_v30 }
  0x1f   :  { %890 = vmatpush3.msra.mxu0 %v1131_v30 }
  0x20   :  { %837 = vmatmul.mubr.msk.f32.gmra.mxu0 %vm58_vm1, %v33_v20  ;;  %891 = vmatprep.subr.mxu0 %v1138_v31 }
  0x21   :  { %892 = vmatpush3.msra.mxu0 %v1138_v31 }
  0x22   :  { %893 = vmatprep.subr.mxu0 %v1145_v32 }
  0x23   :  { %894 = vmatpush3.msra.mxu0 %v1145_v32 }
  0x24   :  { %895 = vmatprep.subr.mxu0 %v1152_v33 }
  0x25   :  { %896 = vmatpush3.msra.mxu0 %v1152_v33 }
  0x26   :  { %897 = vmatprep.subr.mxu0 %v1159_v34 }
  0x27   :  { %898 = vmatpush3.msra.mxu0 %v1159_v34 }
  0x28   :  { %899 = vmatprep.subr.mxu0 %v1166_v35 }
  0x29   :  { %900 = vmatpush3.msra.mxu0 %v1166_v35 }
  0x2a   :  { %901 = vmatprep.subr.mxu0 %v1173_v36 }
  0x2b   :  { %902 = vmatpush3.msra.mxu0 %v1173_v36 }
  0x2c   :  { %903 = vmatprep.subr.mxu0 %v38_v22 }
  0x2d   :  { %904 = vmatpush3.msra.mxu0 %v38_v22 }
  0x2e   :  { %905 = vmatprep.subr.mxu0 %v37_v23 }
  0x2f   :  { %906 = vmatpush3.msra.mxu0 %v37_v23 }
  0x30   :  { %907 = vmatprep.subr.mxu0 %v36_v24 }
  0x31   :  { %908 = vmatpush3.msra.mxu0 %v36_v24 }
  0xc4   :  { %v817_v38 = vpop.f32.mrf.mxu0 }
  0xc5   :  { %v183_v39 = vadd.f32 %v817_v38, %v1182_v37 }
  0xc6   :  { %v177_v40 = vpop.f32.mrf.mxu0 }
  0xc7   :  { %v178_v41 = vadd.f32 %v1182_v37, %v177_v40  ;;  %v257_v44 = vmax.f32 %v183_v39, 0.0 }
  0xc8   :  { %v820_v42 = vpop.f32.mrf.mxu0 }
  0xc9   :  { %v256_v43 = vmax.f32 %v178_v41, 0.0  ;;  %v193_v45 = vadd.f32 %v820_v42, %v1182_v37 }
  0xca   :  { %v187_v46 = vpop.f32.mrf.mxu0 }
  0xcb   :  { %v188_v47 = vadd.f32 %v1182_v37, %v187_v46  ;;  %855 = vmatprep.mubr.msk.f32.mxu1 %vm284_vm2, %v256_v43  ;;  %v259_v50 = vmax.f32 %v193_v45, 0.0 }
  0xcc   :  { %v823_v48 = vpop.f32.mrf.mxu0  ;;  %856 = vmatmul.mubr.msk.f32.vlgmr.msra.gmra.mxu1 %vm284_vm2, %v257_v44 }
  0xcd   :  { %v258_v49 = vmax.f32 %v188_v47, 0.0  ;;  %951 = vmatpush3.msra.mxu1 %v50_v25  ;;  %v203_v51 = vadd.f32 %v823_v48, %v1182_v37  ;;  %v35_v25 = vld [vmem:[%s1273_s2 + $0x8] sm:$0xff] }
  0xce   :  { %v197_v52 = vpop.f32.mrf.mxu0  ;;  %936 = vmatprep.subr.mxu1 %v49_v26  ;;  %909 = vmatprep.subr.mxu0 %v35_v25 }
  0xcf   :  { %v198_v53 = vadd.f32 %v1182_v37, %v197_v52  ;;  %858 = vmatprep.mubr.msk.f32.mxu1 %vm284_vm2, %v258_v49  ;;  %952 = vmatpush3.msra.mxu1 %v49_v26  ;;  %v261_v56 = vmax.f32 %v203_v51, 0.0  ;;  %v722_v26 = vld [vmem:[%s1274_s3 + $0x1] ss:$0 sm:$0xff] }
  0xd0   :  { %v826_v54 = vpop.f32.mrf.mxu0  ;;  %859 = vmatmul.mubr.msk.f32.gmra.mxu1 %vm284_vm2, %v259_v50  ;;  %937 = vmatprep.subr.mxu1 %v48_v27 }
  0xd1   :  { %v260_v55 = vmax.f32 %v198_v53, 0.0  ;;  %953 = vmatpush3.msra.mxu1 %v48_v27  ;;  %v213_v57 = vadd.f32 %v826_v54, %v1182_v37  ;;  %910 = vmatpush3.msra.mxu0 %v35_v25 }
  0xd2   :  { %v207_v58 = vpop.f32.mrf.mxu0  ;;  %938 = vmatprep.subr.mxu1 %v1119_v28 }
  0xd3   :  { %v208_v59 = vadd.f32 %v1182_v37, %v207_v58  ;;  %861 = vmatprep.mubr.msk.f32.mxu1 %vm284_vm2, %v260_v55  ;;  %954 = vmatpush3.msra.mxu1 %v1119_v28  ;;  %v263_v62 = vmax.f32 %v213_v57, 0.0 }
  0xd4   :  { %v829_v60 = vpop.f32.mrf.mxu0  ;;  %862 = vmatmul.mubr.msk.f32.gmra.mxu1 %vm284_vm2, %v261_v56  ;;  %939 = vmatprep.subr.mxu1 %v1124_v29 }
  0xd5   :  { %v262_v61 = vmax.f32 %v208_v59, 0.0  ;;  %955 = vmatpush3.msra.mxu1 %v1124_v29  ;;  %v223_v63 = vadd.f32 %v829_v60, %v1182_v37 }
  0xd6   :  { %v217_v0 = vpop.f32.mrf.mxu0  ;;  %940 = vmatprep.subr.mxu1 %v1131_v30 }
  0xd7   :  { %v218_v1 = vadd.f32 %v1182_v37, %v217_v0  ;;  %864 = vmatprep.mubr.msk.f32.mxu1 %vm284_vm2, %v262_v61  ;;  %956 = vmatpush3.msra.mxu1 %v1131_v30  ;;  %v265_v4 = vmax.f32 %v223_v63, 0.0 }
  0xd8   :  { %v832_v2 = vpop.f32.mrf.mxu0  ;;  %865 = vmatmul.mubr.msk.f32.gmra.mxu1 %vm284_vm2, %v263_v62  ;;  %941 = vmatprep.subr.mxu1 %v1138_v31 }
  0xd9   :  { %v264_v3 = vmax.f32 %v218_v1, 0.0  ;;  %957 = vmatpush3.msra.mxu1 %v1138_v31  ;;  %v233_v5 = vadd.f32 %v832_v2, %v1182_v37 }
  0xda   :  { %v227_v6 = vpop.f32.mrf.mxu0  ;;  %942 = vmatprep.subr.mxu1 %v1145_v32 }
  0xdb   :  { %v228_v7 = vadd.f32 %v1182_v37, %v227_v6  ;;  %867 = vmatprep.mubr.msk.f32.mxu1 %vm284_vm2, %v264_v3  ;;  %958 = vmatpush3.msra.mxu1 %v1145_v32  ;;  %v267_v10 = vmax.f32 %v233_v5, 0.0 }
  0xdc   :  { %v835_v8 = vpop.f32.mrf.mxu0  ;;  %868 = vmatmul.mubr.msk.f32.gmra.mxu1 %vm284_vm2, %v265_v4  ;;  %943 = vmatprep.subr.mxu1 %v1152_v33 }
  0xdd   :  { %v266_v9 = vmax.f32 %v228_v7, 0.0  ;;  %959 = vmatpush3.msra.mxu1 %v1152_v33  ;;  %v243_v11 = vadd.f32 %v835_v8, %v1182_v37 }
  0xde   :  { %v237_v12 = vpop.f32.mrf.mxu0  ;;  %944 = vmatprep.subr.mxu1 %v1159_v34 }
  0xdf   :  { %v238_v13 = vadd.f32 %v1182_v37, %v237_v12  ;;  %870 = vmatprep.mubr.msk.f32.mxu1 %vm284_vm2, %v266_v9  ;;  %960 = vmatpush3.msra.mxu1 %v1159_v34  ;;  %v269_v16 = vmax.f32 %v243_v11, 0.0 }
  0xe0   :  { %v838_v14 = vpop.f32.mrf.mxu0  ;;  %871 = vmatmul.mubr.msk.f32.gmra.mxu1 %vm284_vm2, %v267_v10  ;;  %945 = vmatprep.subr.mxu1 %v1166_v35 }
  0xe1   :  { %v268_v15 = vmax.f32 %v238_v13, 0.0  ;;  %961 = vmatpush3.msra.mxu1 %v1166_v35  ;;  %v253_v17 = vadd.f32 %v838_v14, %v1182_v37 }
  0xe2   :  { %v247_v18 = vpop.f32.mrf.mxu0  ;;  %946 = vmatprep.subr.mxu1 %v1173_v36 }
  0xe3   :  { %v248_v19 = vadd.f32 %v1182_v37, %v247_v18  ;;  %873 = vmatprep.mubr.msk.f32.mxu1 %vm284_vm2, %v268_v15  ;;  %962 = vmatpush3.msra.mxu1 %v1173_v36  ;;  %v271_v21 = vmax.f32 %v253_v17, 0.0  ;;  %v739_v17 = vld [vmem:[%s1274_s3 + $0x2] ss:$0 sm:$0xff]  ;;  %s990_s3 = smov [#allocation2]  }
  0xe4   :  { %874 = vmatmul.mubr.msk.f32.gmra.mxu1 %vm284_vm2, %v269_v16  ;;  %947 = vmatprep.subr.mxu1 %v38_v22  ;;  %s696_s20 = sshll.u32 %s990_s3, 4  ;;  %s697_s20 = int_to_ptr.vmem [resolvable:$true] %s696_s20 }
  0xe5   :  { %v270_v20 = vmax.f32 %v248_v19, 0.0  ;;  %963 = vmatpush3.msra.mxu1 %v38_v22  ;;  %s968_s21 = scalar_lea.vmem %s697_s20, 32  ;;  %p973_p1 = scmp.lt.s32.totalorder %s697_s20, %s697_s20 }
  0xe6   :  { %948 = vmatprep.subr.mxu1 %v37_v23  ;;  %p969_p0 = scmp.ne.s32.totalorder %s697_s20, %s968_s21  ;;  %p974_p2 = scmp.lt.s32.totalorder %s968_s21, %s968_s21 }
  0xe7   :  { %876 = vmatprep.mubr.msk.f32.mxu1 %vm284_vm2, %v270_v20  ;;  %964 = vmatpush3.msra.mxu1 %v37_v23 }
  0xe8   :  { %877 = vmatmul.mubr.msk.f32.gmra.mxu1 %vm284_vm2, %v271_v21  ;;  %949 = vmatprep.subr.mxu1 %v36_v24  ;;  %p975_p3 = por %p974_p2, %p973_p1 }
  0xe9   :  { %965 = vmatpush3.msra.mxu1 %v36_v24 }
  0xea   :  { %950 = vmatprep.subr.mxu1 %v35_v25  ;;  %p976_p4 = pnand %p975_p3, %p969_p0 }
  0xeb   :  { %966 = vmatpush3.msra.mxu1 %v35_v25 }
 0x18c   :  { %v857_v27 = vpop.f32.mrf.mxu1 }
 0x18d   :  { %v405_v28 = vadd.f32 %v857_v27, %v722_v26 }
 0x18e   :  { %v399_v29 = vpop.f32.mrf.mxu1 }
 0x18f   :  { %v400_v30 = vadd.f32 %v722_v26, %v399_v29  ;;  %v479_v33 = vmax.f32 %v405_v28, 0.0 }
 0x190   :  { %v860_v31 = vpop.f32.mrf.mxu1 }
 0x191   :  { %v478_v32 = vmax.f32 %v400_v30, 0.0  ;;  %v415_v34 = vadd.f32 %v860_v31, %v722_v26 }
 0x192   :  { %v409_v35 = vpop.f32.mrf.mxu1 }
 0x193   :  { %v410_v36 = vadd.f32 %v722_v26, %v409_v35  ;;  %911 = vmatprep.mubr.f32.mxu0 %v478_v32  ;;  %v481_v39 = vmax.f32 %v415_v34, 0.0 }
 0x194   :  { %v863_v37 = vpop.f32.mrf.mxu1  ;;  %912 = vmatmul.mubr.f32.vlgmr.msra.gmra.mxu0 %v479_v33 }
 0x195   :  { %v480_v38 = vmax.f32 %v410_v36, 0.0  ;;  %v425_v40 = vadd.f32 %v863_v37, %v722_v26 }
 0x196   :  { %v419_v41 = vpop.f32.mrf.mxu1 }
 0x197   :  { %v420_v42 = vadd.f32 %v722_v26, %v419_v41  ;;  %914 = vmatprep.mubr.f32.mxu0 %v480_v38  ;;  %v483_v45 = vmax.f32 %v425_v40, 0.0 }
 0x198   :  { %v866_v43 = vpop.f32.mrf.mxu1  ;;  %915 = vmatmul.mubr.f32.gmra.mxu0 %v481_v39 }
 0x199   :  { %v482_v44 = vmax.f32 %v420_v42, 0.0  ;;  %v435_v46 = vadd.f32 %v866_v43, %v722_v26 }
 0x19a   :  { %v429_v47 = vpop.f32.mrf.mxu1 }
 0x19b   :  { %v430_v48 = vadd.f32 %v722_v26, %v429_v47  ;;  %917 = vmatprep.mubr.f32.mxu0 %v482_v44  ;;  %v485_v51 = vmax.f32 %v435_v46, 0.0 }
 0x19c   :  { %v869_v49 = vpop.f32.mrf.mxu1  ;;  %918 = vmatmul.mubr.f32.gmra.mxu0 %v483_v45 }
 0x19d   :  { %v484_v50 = vmax.f32 %v430_v48, 0.0  ;;  %v445_v52 = vadd.f32 %v869_v49, %v722_v26 }
 0x19e   :  { %v439_v53 = vpop.f32.mrf.mxu1 }
 0x19f   :  { %v440_v54 = vadd.f32 %v722_v26, %v439_v53  ;;  %920 = vmatprep.mubr.f32.mxu0 %v484_v50  ;;  %v487_v57 = vmax.f32 %v445_v52, 0.0 }
 0x1a0   :  { %v872_v55 = vpop.f32.mrf.mxu1  ;;  %921 = vmatmul.mubr.f32.gmra.mxu0 %v485_v51 }
 0x1a1   :  { %v486_v56 = vmax.f32 %v440_v54, 0.0  ;;  %v455_v58 = vadd.f32 %v872_v55, %v722_v26 }
 0x1a2   :  { %v449_v59 = vpop.f32.mrf.mxu1 }
 0x1a3   :  { %v450_v60 = vadd.f32 %v722_v26, %v449_v59  ;;  %923 = vmatprep.mubr.f32.mxu0 %v486_v56  ;;  %v489_v63 = vmax.f32 %v455_v58, 0.0 }
 0x1a4   :  { %v875_v61 = vpop.f32.mrf.mxu1  ;;  %924 = vmatmul.mubr.f32.gmra.mxu0 %v487_v57 }
 0x1a5   :  { %v488_v62 = vmax.f32 %v450_v60, 0.0  ;;  %v465_v0 = vadd.f32 %v875_v61, %v722_v26 }
 0x1a6   :  { %v459_v1 = vpop.f32.mrf.mxu1 }
 0x1a7   :  { %v460_v2 = vadd.f32 %v722_v26, %v459_v1  ;;  %926 = vmatprep.mubr.f32.mxu0 %v488_v62  ;;  %v491_v5 = vmax.f32 %v465_v0, 0.0 }
 0x1a8   :  { %v878_v3 = vpop.f32.mrf.mxu1  ;;  %927 = vmatmul.mubr.f32.gmra.mxu0 %v489_v63 }
 0x1a9   :  { %v490_v4 = vmax.f32 %v460_v2, 0.0  ;;  %v475_v6 = vadd.f32 %v878_v3, %v722_v26 }
 0x1aa   :  { %v469_v7 = vpop.f32.mrf.mxu1 }
 0x1ab   :  { %v470_v8 = vadd.f32 %v722_v26, %v469_v7  ;;  %929 = vmatprep.mubr.f32.mxu1 %v490_v4  ;;  %v493_v10 = vmax.f32 %v475_v6, 0.0 }
 0x1ac   :  { %930 = vmatmul.mubr.f32.vlgmr.msra.gmra.mxu1 %v491_v5 }
 0x1ad   :  { %v492_v9 = vmax.f32 %v470_v8, 0.0 }
 0x1af   :  { %932 = vmatprep.mubr.f32.mxu1 %v492_v9 }
 0x1b0   :  { %933 = vmatmul.mubr.f32.gmra.mxu1 %v493_v10 }
 0x254   :  { %v913_v11 = vpop.f32.mrf.mxu0 }
 0x255   :  { %v570_v27 = vadd.f32 %v913_v11, %v739_v17 }
 0x256   :  { %v564_v12 = vpop.f32.mrf.mxu0 }
 0x257   :  { %v565_v23 = vadd.f32 %v739_v17, %v564_v12  ;;  %v645_v40 = vsel %vm643_vm3, %v570_v27, -inf }
 0x258   :  { %v916_v13 = vpop.f32.mrf.mxu0 }
 0x259   :  { %v580_v24 = vadd.f32 %v916_v13, %v739_v17  ;;  %v644_v35 = vsel %vm643_vm3, %v565_v23, -inf }
 0x25a   :  { %v574_v14 = vpop.f32.mrf.mxu0 }
 0x25b   :  { %v575_v19 = vadd.f32 %v739_v17, %v574_v14  ;;  %v647_v36 = vsel %vm643_vm3, %v580_v24, -inf }
 0x25c   :  { %v919_v15 = vpop.f32.mrf.mxu0 }
 0x25d   :  { %v590_v25 = vadd.f32 %v919_v15, %v739_v17  ;;  %v646_v29 = vsel %vm643_vm3, %v575_v19, -inf }
 0x25e   :  { %v584_v16 = vpop.f32.mrf.mxu0 }
 0x25f   :  { %v585_v20 = vadd.f32 %v739_v17, %v584_v16  ;;  %v650_v37 = vsel %vm643_vm3, %v590_v25, -inf }
 0x260   :  { %v922_v18 = vpop.f32.mrf.mxu0  ;;  %v651_v41 = vmax.f32 %v645_v40, %v650_v37 }
 0x261   :  { %v600_v21 = vadd.f32 %v922_v18, %v739_v17  ;;  %v648_v30 = vsel %vm643_vm3, %v585_v20, -inf }
 0x262   :  { %v594_v22 = vpop.f32.mrf.mxu0  ;;  %v649_v38 = vmax.f32 %v644_v35, %v648_v30 }
 0x263   :  { %v595_v26 = vadd.f32 %v739_v17, %v594_v22  ;;  %v654_v31 = vsel %vm643_vm3, %v600_v21, -inf }
 0x264   :  { %v925_v28 = vpop.f32.mrf.mxu0  ;;  %v655_v39 = vmax.f32 %v647_v36, %v654_v31  ;;  %v656_v44 = vmax.f32 %v649_v38, %v651_v41 }
 0x265   :  { %v652_v32 = vsel %vm643_vm3, %v595_v26, -inf  ;;  %v610_v52 = vadd.f32 %v925_v28, %v739_v17 }
 0x266   :  { %v653_v33 = vmax.f32 %v646_v29, %v652_v32  ;;  %v604_v34 = vpop.f32.mrf.mxu0 }
 0x267   :  { %v605_v49 = vadd.f32 %v739_v17, %v604_v34  ;;  %v666_v1 = vsel %vm643_vm3, %v610_v52, -inf }
 0x268   :  { %v657_v42 = vmax.f32 %v653_v33, %v655_v39  ;;  %v928_v43 = vpop.f32.mrf.mxu0 }
 0x269   :  { %v620_v54 = vadd.f32 %v928_v43, %v739_v17  ;;  %v665_v60 = vsel %vm643_vm3, %v605_v49, -inf }
 0x26a   :  { %v658_v46 = vmax.f32 %v656_v44, %v657_v42  ;;  %v614_v47 = vpop.f32.mrf.mxu0 }
 0x26b   :  { %v615_v55 = vadd.f32 %v739_v17, %v614_v47  ;;  %v668_v2 = vsel %vm643_vm3, %v620_v54, -inf }
 0x26c   :  { %v931_v45 = vpop.f32.mrf.mxu1  ;;  %v659_v58 = vrot.slane %v658_v46, 4 }
 0x26d   :  { %v630_v50 = vadd.f32 %v931_v45, %v739_v17  ;;  %v667_v3 = vsel %vm643_vm3, %v615_v55, -inf }
 0x26e   :  { %v624_v48 = vpop.f32.mrf.mxu1  ;;  %v660_v5 = vmax.f32 %v658_v46, %v659_v58 }
 0x26f   :  { %v625_v51 = vadd.f32 %v739_v17, %v624_v48  ;;  %v671_v61 = vsel %vm643_vm3, %v630_v50, -inf }
 0x270   :  { %v934_v53 = vpop.f32.mrf.mxu1  ;;  %v672_v6 = vmax.f32 %v666_v1, %v671_v61  ;;  %v661_v12 = vrot.slane %v660_v5, 2 }
 0x271   :  { %v669_v56 = vsel %vm643_vm3, %v625_v51, -inf  ;;  %v640_v57 = vadd.f32 %v934_v53, %v739_v17 }
 0x272   :  { %v634_v59 = vpop.f32.mrf.mxu1  ;;  %v670_v0 = vmax.f32 %v665_v60, %v669_v56  ;;  %v662_v15 = vmax.f32 %v660_v5, %v661_v12 }
 0x273   :  { %v675_v62 = vsel %vm643_vm3, %v640_v57, -inf  ;;  %v635_v63 = vadd.f32 %v739_v17, %v634_v59 }
 0x274   :  { %v676_v7 = vmax.f32 %v668_v2, %v675_v62  ;;  %v677_v9 = vmax.f32 %v670_v0, %v672_v6  ;;  %v663_v17 = vrot.slane %v662_v15, 1 }
 0x275   :  { %v673_v4 = vsel %vm643_vm3, %v635_v63, -inf }
 0x276   :  { %v674_v8 = vmax.f32 %v667_v3, %v673_v4  ;;  %v664_v20 = vmax.f32 %v662_v15, %v663_v17 }
 0x278   :  { %v678_v10 = vmax.f32 %v674_v8, %v676_v7 }
 0x27a   :  { %v679_v11 = vmax.f32 %v677_v9, %v678_v10 }
 0x27c   :  { %v680_v13 = vrot.slane %v679_v11, 4 }
 0x27e   :  { %v681_v14 = vmax.f32 %v679_v11, %v680_v13 }
 0x280   :  { %v682_v16 = vrot.slane %v681_v14, 2 }
 0x282   :  { %v683_v18 = vmax.f32 %v681_v14, %v682_v16 }
 0x284   :  { %v684_v19 = vrot.slane %v683_v18, 1 }
 0x286   :  { %v685_v21 = vmax.f32 %v683_v18, %v684_v19 }
 0x288   :  { %v687_v22 = vsel %vm686_vm4, %v664_v20, %v685_v21 }
 0x289   :  { %689 = vst.msk [vmem:[#allocation2] sm:$0x3] %vm688_vm5, %v687_v22 }
 0x28a   :  { %979 = shalt.err (!%p976_p4)
}
 0x28b   :  { %699 = dma.vmem_to_hbm [thread:$0]  %s697_s20, 32, %s1275_s4, [#allocation3]  }
 0x28c   :  { %988 = dma.done.wait [#allocation3], 32  }
 0x28d   :  { %989 = vsyncadd [#allocation3], 4294967264 }
 0x28e   :  { %703 = vsyncpa [#allocation3], 1 }

</bundles_post_ra>
